<compile_context>
chip_gen: v6e
topology: v6e:2x2x1
jax: 0.10.0
libtpu: 0.0.40
codegen_flags: <defaults>
</compile_context>

<pallas_src>
import functools

import jax
import jax.numpy as jnp
from jax.experimental import pallas as pl
from jax.experimental.pallas import tpu as pltpu


def _recon_sumsq_kernel(img_ref, rec_ref, out_ref, *, batch, tb, nbps):
    j = pl.program_id(1)

    # Zero the resident accumulator (output block index is constant across the j axis).
    @pl.when(j == 0)
    def _init():
        out_ref[...] = jnp.zeros_like(out_ref)

    # Global batch-block id -> row validity mask for the ragged last block.
    # NOTE: must stay in sync with the input index_map (c * nbps + j).
    gi = pl.program_id(0) * nbps + j
    rows = gi * tb + jax.lax.broadcasted_iota(jnp.int32, (tb, 1), 0)
    valid = rows < batch                                   # (tb, 1) bool

    diff = rec_ref[...].astype(jnp.float32) - img_ref[...].astype(jnp.float32)
    sq = jnp.where(valid, diff * diff, 0.0)

    # Accumulate with pure elementwise adds: fold the batch-tile axis into sublane groups of 8
    # (tile-aligned reshape) and reduce only along the group axis.
    d = sq.shape[-1]
    out_ref[...] += sq.reshape(tb // 8, 8, d).sum(axis=0)


def capsule_loss(images, labels, classes, reconstructions, *, block_rows=None):
    """images: [B, C, H, W]; labels, classes: [B, K]; reconstructions: [B, C*H*W]."""
    assert images.size == reconstructions.size, "images and reconstructions must have equal numel"
    b = reconstructions.shape[0]
    d = reconstructions.shape[1]

    # ---- margin loss: tiny (B*K elements), done in plain JAX -- not worth streaming ----------
    classes_f = classes.astype(jnp.float32)
    labels_f = labels.astype(jnp.float32)
    left = jnp.maximum(0.9 - classes_f, 0.0) ** 2          # F.relu(0.9 - classes) ** 2
    right = jnp.maximum(classes_f - 0.1, 0.0) ** 2         # F.relu(classes - 0.1) ** 2
    margin_total = jnp.sum(labels_f * left + 0.5 * (1.0 - labels_f) * right)

    # Contiguous NCHW -> (B, D): metadata-only view (no HBM copy), lane-dense last dim.
    images_flat = images.reshape(b, -1)

    # ---- tile / grid selection ----------------------------------------------------------------
    # Two double-buffered input streams: 2 buffers * (img + rec itemsize) * tb * D <= budget,
    # leaving headroom under the 48 MiB VMEM limit we request (safe on v5e/v6e/v7x).
    row_bytes = (images_flat.dtype.itemsize + reconstructions.dtype.itemsize) * d
    if block_rows is None:
        stream_budget = 36 * 1024 * 1024
        tb = stream_budget // (2 * row_bytes)
        tb = max(8, min(4096, (tb // 8) * 8))
    else:
        tb = max(8, (block_rows // 8) * 8)
    tb = min(tb, max(8, ((b + 7) // 8) * 8))               # no point tiling past the padded batch

    nb = pl.cdiv(b, tb)                                    # total batch blocks
    # 2-way leading split only when it costs nothing (even block count -> no clamped duplicate
    # block / no wasted HBM traffic).  On v7x the "parallel" axis lets the 2 TCs split it;
    # on 1-TC v5e/v6e it is just a short outer loop over the same useful blocks.
    nsplit = 2 if (nb >= 2 and nb % 2 == 0) else 1
    nbps = nb // nsplit                                    # exact: nsplit * nbps == nb

    def batch_block(c, j):
        return (c * nbps + j, 0)

    kernel = functools.partial(_recon_sumsq_kernel, batch=b, tb=tb, nbps=nbps)

    out_bytes = nsplit * 8 * d * 4
    cost = pl.CostEstimate(
        flops=3 * b * d,                                   # sub, mul, add per element
        transcendentals=0,
        bytes_accessed=row_bytes * b + out_bytes,
    )

    out_r = pl.pallas_call(
        kernel,
        out_shape=jax.ShapeDtypeStruct((nsplit * 8, d), jnp.float32),  # per-split recon partials
        grid_spec=pltpu.PrefetchScalarGridSpec(
            num_scalar_prefetch=0,
            grid=(nsplit, nbps),
            in_specs=[
                pl.BlockSpec((tb, d), batch_block),        # images (flattened)
                pl.BlockSpec((tb, d), batch_block),        # reconstructions
            ],
            out_specs=pl.BlockSpec((8, d), lambda c, j: (c, 0)),
        ),
        compiler_params=pltpu.CompilerParams(
            dimension_semantics=("parallel", "arbitrary"),
            vmem_limit_bytes=48 * 1024 * 1024,
        ),
        cost_estimate=cost,
    )(images_flat, reconstructions)

    # Final tiny cross-lane reduction + normalization by the true batch size.
    recon_total = jnp.sum(out_r)
    return (margin_total + 0.0005 * recon_total) / b


def _reference(images, labels, classes, reconstructions):
    left = jnp.maximum(0.9 - classes, 0.0) ** 2
    right = jnp.maximum(classes - 0.1, 0.0) ** 2
    margin = jnp.sum(labels * left + 0.5 * (1.0 - labels) * right)
    img_flat = images.reshape(reconstructions.shape[0], -1)
    recon = jnp.sum((reconstructions - img_flat) ** 2)
    return (margin + 0.0005 * recon) / images.shape[0]


if __name__ == "__main__":
    key = jax.random.PRNGKey(0)
    k1, k2, k3, k4 = jax.random.split(key, 4)

    B, C, H, W, K = 2, 4, 16, 16, 10
    D = C * H * W

    images = jax.random.normal(k1, (B, C, H, W), dtype=jnp.float32)
    label_idx = jax.random.randint(k2, (B,), 0, K)
    labels = jax.nn.one_hot(label_idx, K, dtype=jnp.float32)
    classes = jax.nn.sigmoid(jax.random.normal(k3, (B, K), dtype=jnp.float32))
    reconstructions = jax.random.normal(k4, (B, D), dtype=jnp.float32)

    loss = capsule_loss(images, labels, classes, reconstructions)
    jax.block_until_ready(loss)
    ref = _reference(images, labels, classes, reconstructions)
    assert jnp.allclose(loss, ref, rtol=1e-5, atol=1e-5), (loss, ref)

    # Ragged last block with an odd block count (forces nsplit=1, no wasted blocks).
    B2 = 37
    images2 = jax.random.normal(k1, (B2, C, H, W), dtype=jnp.float32)
    labels2 = jax.nn.one_hot(jax.random.randint(k2, (B2,), 0, K), K, dtype=jnp.float32)
    classes2 = jax.nn.sigmoid(jax.random.normal(k3, (B2, K), dtype=jnp.float32))
    recon2 = jax.random.normal(k4, (B2, D), dtype=jnp.float32)

    loss2 = capsule_loss(images2, labels2, classes2, recon2, block_rows=8)
    jax.block_until_ready(loss2)
    ref2 = _reference(images2, labels2, classes2, recon2)
    assert jnp.allclose(loss2, ref2, rtol=1e-5, atol=1e-5), (loss2, ref2)

    # Even block count -> exercises the 2-way "parallel" leading split (zero duplicate blocks).
    B3 = 64
    images3 = jax.random.normal(k1, (B3, C, H, W), dtype=jnp.float32)
    labels3 = jax.nn.one_hot(jax.random.randint(k2, (B3,), 0, K), K, dtype=jnp.float32)
    classes3 = jax.nn.sigmoid(jax.random.normal(k3, (B3, K), dtype=jnp.float32))
    recon3 = jax.random.normal(k4, (B3, D), dtype=jnp.float32)

    loss3 = capsule_loss(images3, labels3, classes3, recon3, block_rows=8)
    jax.block_until_ready(loss3)
    ref3 = _reference(images3, labels3, classes3, recon3)
    assert jnp.allclose(loss3, ref3, rtol=1e-5, atol=1e-5), (loss3, ref3)

    print("KERNEL_OK")
</pallas_src>

<mosaic_0001>
module attributes {stable_mosaic.version = 11 : i64} {
  func.func @_recon_sumsq_kernel(%arg0: i32, %arg1: i32, %arg2: memref<8x1024xf32, #tpu.memory_space<vmem>>, %arg3: memref<8x1024xf32, #tpu.memory_space<vmem>>, %arg4: memref<8x1024xf32, #tpu.memory_space<vmem>>) attributes {dimension_semantics = [#tpu.dimension_semantics<parallel>, #tpu.dimension_semantics<arbitrary>], iteration_bounds = array<i64: 1, 1>, scalar_prefetch = 0 : i64, scratch_operands = 0 : i64, tpu.core_type = #tpu.core_type<tc>, window_params = [{transform_indices = @transform_0, window_bounds = array<i64: 8, 1024>}, {transform_indices = @transform_1, window_bounds = array<i64: 8, 1024>}, {transform_indices = @transform_2, window_bounds = array<i64: 8, 1024>}]} {
    %c0_i32 = arith.constant 0 : i32
    %0 = arith.cmpi eq, %arg1, %c0_i32 : i32
    %1 = arith.extui %0 : i1 to i32
    %c0_i32_0 = arith.constant 0 : i32
    %2 = arith.cmpi ne, %1, %c0_i32_0 : i32
    scf.if %2 {
      %cst_9 = arith.constant 0.000000e+00 : f32
      %24 = vector.broadcast %cst_9 : f32 to vector<8x1024xf32>
      %c0_10 = arith.constant 0 : index
      %c0_11 = arith.constant 0 : index
      %25 = vector.load %arg4[%c0_10, %c0_11] : memref<8x1024xf32, #tpu.memory_space<vmem>>, vector<8x1024xf32>
      tpu.vector_store %arg4[%c0_10, %c0_11], %24 {strides = array<i32>} : memref<8x1024xf32, #tpu.memory_space<vmem>>, vector<8x1024xf32>,
    } else {
    }
    %c1_i32 = arith.constant 1 : i32
    %3 = arith.muli %arg0, %c1_i32 : i32
    %4 = arith.addi %3, %arg1 : i32
    %c8_i32 = arith.constant 8 : i32
    %5 = arith.muli %4, %c8_i32 : i32
    %6 = tpu.iota {dimensions = array<i32: 0>} : vector<8x1xi32>
    %7 = vector.broadcast %5 : i32 to vector<8x1xi32>
    %8 = arith.addi %7, %6 : vector<8x1xi32>
    %c2_i32 = arith.constant 2 : i32
    %9 = vector.broadcast %c2_i32 : i32 to vector<8x1xi32>
    %10 = arith.cmpi slt, %8, %9 : vector<8x1xi32>
    %c0 = arith.constant 0 : index
    %c0_1 = arith.constant 0 : index
    %11 = vector.load %arg3[%c0, %c0_1] : memref<8x1024xf32, #tpu.memory_space<vmem>>, vector<8x1024xf32>
    %c0_2 = arith.constant 0 : index
    %c0_3 = arith.constant 0 : index
    %12 = vector.load %arg2[%c0_2, %c0_3] : memref<8x1024xf32, #tpu.memory_space<vmem>>, vector<8x1024xf32>
    %13 = arith.subf %11, %12 : vector<8x1024xf32>
    %14 = arith.mulf %13, %13 : vector<8x1024xf32>
    %cst = arith.constant 0.000000e+00 : f32
    %15 = vector.shape_cast %10 : vector<8x1xi1> to vector<8x1xi1>
    %16 = vector.broadcast %15 : vector<8x1xi1> to vector<8x1024xi1>
    %17 = vector.broadcast %cst : f32 to vector<8x1024xf32>
    %18 = arith.select %16, %14, %17 : vector<8x1024xi1>, vector<8x1024xf32>
    %c0_4 = arith.constant 0 : index
    %c0_5 = arith.constant 0 : index
    %19 = vector.load %arg4[%c0_4, %c0_5] : memref<8x1024xf32, #tpu.memory_space<vmem>>, vector<8x1024xf32>
    %20 = vector.shape_cast %18 : vector<8x1024xf32> to vector<1x8x1024xf32>
    %cst_6 = arith.constant dense<0.000000e+00> : vector<8x1024xf32>
    %21 = vector.multi_reduction <add>, %20, %cst_6 [0] : vector<1x8x1024xf32> to vector<8x1024xf32>
    %22 = arith.addf %19, %21 : vector<8x1024xf32>
    %c0_7 = arith.constant 0 : index
    %c0_8 = arith.constant 0 : index
    %23 = vector.load %arg4[%c0_7, %c0_8] : memref<8x1024xf32, #tpu.memory_space<vmem>>, vector<8x1024xf32>
    tpu.vector_store %arg4[%c0_7, %c0_8], %22 {strides = array<i32>} : memref<8x1024xf32, #tpu.memory_space<vmem>>, vector<8x1024xf32>,
    return
  }
  func.func @transform_0(%arg0: i32, %arg1: i32) -> (i32, i32) {
    %c1_i32 = arith.constant 1 : i32
    %0 = arith.muli %arg0, %c1_i32 : i32
    %1 = arith.addi %0, %arg1 : i32
    %c0_i32 = arith.constant 0 : i32
    %c0_i32_0 = arith.constant 0 : i32
    return %1, %c0_i32 : i32, i32
  }
  func.func @transform_1(%arg0: i32, %arg1: i32) -> (i32, i32) {
    %c1_i32 = arith.constant 1 : i32
    %0 = arith.muli %arg0, %c1_i32 : i32
    %1 = arith.addi %0, %arg1 : i32
    %c0_i32 = arith.constant 0 : i32
    %c0_i32_0 = arith.constant 0 : i32
    return %1, %c0_i32 : i32, i32
  }
  func.func @transform_2(%arg0: i32, %arg1: i32) -> (i32, i32) {
    %c0_i32 = arith.constant 0 : i32
    %c0_i32_0 = arith.constant 0 : i32
    return %arg0, %c0_i32 : i32, i32
  }
}

</mosaic_0001>

<bundles_post_ra>
// kernel: tpu_custom_call.1
= control target key start
LH: loop header
LB: loop body
LE: loop exit
PB: predicated region body
PF: predicated region fallthrough
CT: control target
= control target key end

     0   :  { %7 = vsyncpa [#allocation3], 0  ;;  %s390_s0 = inlined_call_operand.hbm [shape: f32[2,1024], index: 0, kind: input, shape index: {}]   ;;  %s391_s1 = inlined_call_operand.hbm [shape: f32[2,1024], index: 1, kind: input, shape index: {}]   ;;  %s392_s2 = inlined_call_operand.hbm [shape: f32[8,1024], index: 2, kind: output, shape index: {}]  }
   0x1   :  { %8 = vsyncpa [#allocation6], 0 }
   0x2   :  { %9 = vsyncpa [#allocation4], 0 }
   0x3   :  { %19 = vsyncadd [#allocation3], 768  ;;  %s340_s9 = smov [#allocation2]  }
   0x4   :  { %s25_s10 = sshll.u32 %s340_s9, 4  ;;  %s26_s10 = int_to_ptr.vmem [resolvable:$true] %s25_s10 }
   0x5   :  { %s282_s11 = scalar_lea.vmem %s26_s10, 256  ;;  %s286_s12 = scalar_lea.vmem %s26_s10, 1024 }
   0x6   :  { %p283_p0 = scmp.ne.s32.totalorder %s26_s10, %s282_s11  ;;  %p287_p1 = scmp.lt.s32.totalorder %s26_s10, %s26_s10 }
   0x7   :  { %p288_p2 = scmp.lt.s32.totalorder %s286_s12, %s282_s11 }
   0x9   :  { %p289_p3 = por %p288_p2, %p287_p1 }
   0xb   :  { %p290_p4 = pnand %p289_p3, %p283_p0 }
   0xd   :  { %293 = shalt.err (!%p290_p4)
}
   0xe   :  { %s341_s13 = smov 256   ;;  %s342_s14 = smov 16  }
   0xf   :  { %31 = dma.hbm_to_vmem [thread:$0]  %s390_s0, 256, %s26_s10, [#allocation3], %s341_s13, %s341_s13, %s342_s14  }
  0x10   :  { %41 = vsyncadd [#allocation6], 768  ;;  %s343_s17 = smov [#allocation5]  }
  0x11   :  { %s47_s18 = sshll.u32 %s343_s17, 4  ;;  %s48_s18 = int_to_ptr.vmem [resolvable:$true] %s47_s18 }
  0x12   :  { %s302_s19 = scalar_lea.vmem %s48_s18, 256  ;;  %s306_s20 = scalar_lea.vmem %s48_s18, 1024 }
  0x13   :  { %p303_p5 = scmp.ne.s32.totalorder %s48_s18, %s302_s19  ;;  %p307_p6 = scmp.lt.s32.totalorder %s48_s18, %s48_s18 }
  0x14   :  { %p308_p7 = scmp.lt.s32.totalorder %s306_s20, %s302_s19 }
  0x16   :  { %p309_p8 = por %p308_p7, %p307_p6 }
  0x18   :  { %p310_p9 = pnand %p309_p8, %p303_p5 }
  0x1a   :  { %313 = shalt.err (!%p310_p9)
}
  0x1b   :  { %53 = dma.hbm_to_vmem [thread:$0]  %s391_s1, 256, %s48_s18, [#allocation6], %s341_s13, %s341_s13, %s342_s14  }
  0x1c   :  { %334 = dma.done.wait [#allocation3], 1024  }
  0x1d   :  { %335 = vsyncadd [#allocation3], 4294966272 }
  0x1e   :  { %336 = dma.done.wait [#allocation6], 1024  }
  0x1f   :  { %337 = vsyncadd [#allocation6], 4294966272  ;;  %v84_v0 = vlaneseq  ;;  %v344_v1 = vmov 1983009808   ;;  %v89_v4 = vld [vmem:[#allocation5] sm:$0xff]  ;;  %v91_v5 = vld [vmem:[#allocation5 + $0x10] sm:$0xff] }
  0x20   :  { %v136_v2 = vunpack.c.l.s4 %v344_v1  ;;  %v93_v6 = vld [vmem:[#allocation5 + $0x20] sm:$0xff]  ;;  %v95_v8 = vld [vmem:[#allocation5 + $0x30] sm:$0xff]  ;;  %v90_v15 = vld [vmem:[#allocation5 + $0x8] sm:$0xff]  ;;  %s345_s0 = smov [#allocation7]  }
  0x21   :  { %v367_v3 = vshrl.u32 %v84_v0, 7  ;;  %v97_v9 = vld [vmem:[#allocation2] sm:$0xff]  ;;  %v99_v10 = vld [vmem:[#allocation2 + $0x10] sm:$0xff]  ;;  %v92_v18 = vld [vmem:[#allocation5 + $0x18] sm:$0xff]  ;;  %s257_s1 = sshll.u32 %s345_s0, 4  ;;  %s258_s1 = int_to_ptr.vmem [resolvable:$true] %s257_s1 }
  0x22   :  { %v137_v7 = vunpack.c.0.s8 %v136_v2  ;;  %v101_v11 = vld [vmem:[#allocation2 + $0x20] sm:$0xff]  ;;  %v103_v12 = vld [vmem:[#allocation2 + $0x30] sm:$0xff]  ;;  %v105_v13 = vsub.f32 %v89_v4, %v97_v9  ;;  %v107_v14 = vsub.f32 %v91_v5, %v99_v10  ;;  %v94_v19 = vld [vmem:[#allocation5 + $0x28] sm:$0xff]  ;;  %s314_s23 = scalar_lea.vmem %s258_s1, 1024  ;;  %p319_p11 = scmp.lt.s32.totalorder %s258_s1, %s258_s1 }
  0x23   :  { %v109_v16 = vsub.f32 %v93_v6, %v101_v11  ;;  %v111_v17 = vsub.f32 %v95_v8, %v103_v12  ;;  %v96_v20 = vld [vmem:[#allocation5 + $0x38] sm:$0xff]  ;;  %v98_v24 = vld [vmem:[#allocation2 + $0x8] sm:$0xff]  ;;  %vm88_vm0 = vcmp.lt.s32.totalorder %v367_v3, 2  ;;  %p315_p10 = scmp.ne.s32.totalorder %s258_s1, %s314_s23  ;;  %p320_p12 = scmp.lt.s32.totalorder %s314_s23, %s314_s23 }
  0x24   :  { %v113_v21 = vmul.f32 %v105_v13, %v105_v13  ;;  %v115_v22 = vmul.f32 %v107_v14, %v107_v14  ;;  %v140_v23 = vsub.s32 %v137_v7, %v367_v3  ;;  %v100_v25 = vld [vmem:[#allocation2 + $0x18] sm:$0xff]  ;;  %v102_v26 = vld [vmem:[#allocation2 + $0x28] sm:$0xff]  ;;  %v106_v30 = vsub.f32 %v90_v15, %v98_v24 }
  0x25   :  { %v117_v27 = vmul.f32 %v109_v16, %v109_v16  ;;  %v119_v28 = vmul.f32 %v111_v17, %v111_v17  ;;  %v104_v29 = vld [vmem:[#allocation2 + $0x38] sm:$0xff]  ;;  %v108_v31 = vsub.f32 %v92_v18, %v100_v25  ;;  %v110_v34 = vsub.f32 %v94_v19, %v102_v26  ;;  %p321_p13 = por %p320_p12, %p319_p11 }
  0x26   :  { %v131_v32 = vcombine.low %v113_v21, %v115_v22  ;;  %v132_v33 = vcombine.high %v113_v21, %v115_v22  ;;  %v112_v35 = vsub.f32 %v96_v20, %v104_v29  ;;  %v114_v38 = vmul.f32 %v106_v30, %v106_v30 }
  0x27   :  { %v133_v36 = vcombine.low %v117_v27, %v119_v28  ;;  %v134_v37 = vcombine.high %v117_v27, %v119_v28  ;;  %v116_v39 = vmul.f32 %v108_v31, %v108_v31  ;;  %v118_v42 = vmul.f32 %v110_v34, %v110_v34  ;;  %p322_p0 = pnand %p321_p13, %p315_p10 }
  0x28   :  { %v141_v40 = vrot.slane %v131_v32, %v140_v23  ;;  %v148_v41 = vrot.slane %v132_v33, %v140_v23  ;;  %v120_v43 = vmul.f32 %v112_v35, %v112_v35 }
  0x29   :  { %v155_v44 = vrot.slane %v133_v36, %v140_v23  ;;  %v162_v45 = vrot.slane %v134_v37, %v140_v23  ;;  %v167_v46 = vcombine.low %v114_v38, %v116_v39  ;;  %v168_v47 = vcombine.high %v114_v38, %v116_v39 }
  0x2a   :  { %v169_v48 = vcombine.low %v118_v42, %v120_v43  ;;  %v170_v49 = vcombine.high %v118_v42, %v120_v43 }
  0x2b   :  { %v163_v50 = vcombine.low %v141_v40, %v155_v44  ;;  %v164_v51 = vcombine.high %v141_v40, %v155_v44  ;;  %v165_v52 = vcombine.low %v148_v41, %v162_v45  ;;  %v166_v53 = vcombine.high %v148_v41, %v162_v45 }
  0x2c   :  { %v177_v54 = vrot.slane %v167_v46, %v140_v23  ;;  %v191_v55 = vrot.slane %v169_v48, %v140_v23  ;;  %v184_v56 = vrot.slane %v168_v47, %v140_v23  ;;  %v198_v57 = vrot.slane %v170_v49, %v140_v23 }
  0x2d   :  { %v211_v58 = vsel %vm88_vm0, %v163_v50, 0.0  ;;  %v212_v59 = vsel %vm88_vm0, %v164_v51, 0.0  ;;  %v213_v60 = vsel %vm88_vm0, %v165_v52, 0.0  ;;  %v214_v61 = vsel %vm88_vm0, %v166_v53, 0.0 }
  0x2e   :  { %v199_v62 = vcombine.low %v177_v54, %v191_v55  ;;  %v200_v63 = vcombine.high %v177_v54, %v191_v55  ;;  %v201_v0 = vcombine.low %v184_v56, %v198_v57  ;;  %v202_v1 = vcombine.high %v184_v56, %v198_v57  ;;  %243 = vst [vmem:[#allocation7] sm:$0xff] %v211_v58 }
  0x2f   :  { %244 = vst [vmem:[#allocation7 + $0x8] sm:$0xff] %v212_v59  ;;  %245 = vst [vmem:[#allocation7 + $0x10] sm:$0xff] %v213_v60 }
  0x30   :  { %246 = vst [vmem:[#allocation7 + $0x18] sm:$0xff] %v214_v61  ;;  %v215_v2 = vsel %vm88_vm0, %v199_v62, 0.0  ;;  %v216_v4 = vsel %vm88_vm0, %v200_v63, 0.0  ;;  %v217_v5 = vsel %vm88_vm0, %v201_v0, 0.0  ;;  %v218_v6 = vsel %vm88_vm0, %v202_v1, 0.0 }
  0x31   :  { %247 = vst [vmem:[#allocation7 + $0x20] sm:$0xff] %v215_v2  ;;  %248 = vst [vmem:[#allocation7 + $0x28] sm:$0xff] %v216_v4 }
  0x32   :  { %249 = vst [vmem:[#allocation7 + $0x30] sm:$0xff] %v217_v5  ;;  %250 = vst [vmem:[#allocation7 + $0x38] sm:$0xff] %v218_v6 }
  0x33   :  { %325 = shalt.err (!%p322_p0)
}
  0x34   :  { %260 = dma.vmem_to_hbm [thread:$0]  %s258_s1, 1024, %s392_s2, [#allocation4]  }
  0x35   :  { %338 = dma.done.wait [#allocation4], 1024  }
  0x36   :  { %339 = vsyncadd [#allocation4], 4294966272 }
  0x37   :  { %264 = vsyncpa [#allocation3], 1 }
  0x38   :  { %265 = vsyncpa [#allocation6], 1 }
  0x39   :  { %266 = vsyncpa [#allocation4], 1 }

</bundles_post_ra>
